<compile_context>
chip_gen: v7x
topology: tpu7x:2x2x1
jax: 0.10.0
libtpu: 0.0.40
codegen_flags: <defaults>
</compile_context>

<pallas_src>
import jax
import jax.numpy as jnp
from jax.experimental import pallas as pl
from jax.experimental.pallas import tpu as pltpu


_LANE = 128     # feature dims padded to multiples of the 128-wide lane axis
_SUBLANE = 8    # slab row offsets kept 8-aligned (f32 sublane)


def _round_up(n, m):
    return ((n + m - 1) // m) * m


# --------------------------------------------------------------------------
# Plan: simulate forward() with widths only, to learn how each skip weight
# must be split into per-chunk sub-matrices (the concat becomes split dots).
# --------------------------------------------------------------------------
def _plan_forward(layers, skip_connection, in_dim):
    skip_splits = {}          # layer idx -> list of chunk widths, concat order
    tmp_skip_w = None         # width of pending skip output (or None)
    tmp_widths = []           # widths of tmp_layers, in list order
    w = in_dim
    for idx, layer in enumerate(layers):
        if tmp_skip_w is not None and layer[0] == "linear":
            out_w = layer[1].shape[1]
            if idx in skip_connection:
                skip_splits[idx] = [w] + list(tmp_widths)   # cat([x, *tmp_layers])
                tmp_widths.insert(0, w)
                tmp_skip_w = skip_connection[idx].shape[1]
            else:
                tmp_skip_w = None
                tmp_widths = []
            w = out_w
        else:
            if idx in skip_connection:
                skip_splits[idx] = [w]                      # just x
                tmp_widths.append(w)
                tmp_skip_w = skip_connection[idx].shape[1]
            if layer[0] == "linear":
                w = layer[1].shape[1]
    return skip_splits, w


# --------------------------------------------------------------------------
# Build the fused forward: one pallas_call for the whole network.
# layers: list of ("linear", W (K,N) f32, b (1,N) f32) or ("relu",)
# skip_connection: dict {layer_idx -> W_skip (K_total, N_next) f32, bias-free}
# Weights are stored pre-transposed (in_features, out_features): y = x @ W + b.
# --------------------------------------------------------------------------
def build_fused_forward(layers, skip_connection, in_dim):
    skip_splits, out_dim = _plan_forward(layers, skip_connection, in_dim)

    # ----- slab width = max padded output width of any parameter -----
    all_np = [_round_up(l[1].shape[1], _LANE) for l in layers if l[0] == "linear"]
    all_np += [_round_up(w.shape[1], _LANE) for w in skip_connection.values()]
    slab_w = max(all_np) if all_np else _LANE

    # ----- pack every (zero-padded) parameter into one contiguous slab -----
    pieces = []
    row_off = 0

    def _append(mat, rows_padded):
        nonlocal row_off
        r, c = mat.shape
        piece = jnp.zeros((rows_padded, slab_w), jnp.float32)
        piece = piece.at[:r, :c].set(mat.astype(jnp.float32))
        pieces.append(piece)
        off = row_off
        row_off += rows_padded
        return off

    linear_meta = {}   # idx -> (w_off, Kp, b_off, Np)
    for idx, layer in enumerate(layers):
        if layer[0] == "linear":
            w, b = layer[1], layer[2]
            K, N = w.shape
            Kp, Np = _round_up(K, _LANE), _round_up(N, _LANE)
            w_off = _append(w, Kp)
            b_off = _append(jnp.reshape(b, (1, N)), _SUBLANE)
            linear_meta[idx] = (w_off, Kp, b_off, Np)

    skip_meta = {}     # idx -> ([(chunk_off, chunk_Kp), ...], Np)
    for idx in sorted(skip_connection.keys()):
        w = skip_connection[idx]
        widths = skip_splits[idx]
        assert sum(widths) == w.shape[0], (widths, w.shape)
        Np = _round_up(w.shape[1], _LANE)
        infos = []
        r0 = 0
        for cw in widths:
            chunk = w[r0:r0 + cw]
            r0 += cw
            cKp = _round_up(cw, _LANE)
            infos.append((_append(chunk, cKp), cKp))
        skip_meta[idx] = (infos, Np)

    slab = jnp.concatenate(pieces, axis=0)          # built once, passed at runtime
    slab_bytes = row_off * slab_w * 4

    # ----- fused kernel body: entire forward chained in VMEM / vregs -----
    def kernel(x_ref, slab_ref, o_ref):
        def dot(a, off, Kp, Np):
            # Raw input x may be unpadded (k = in_dim < Kp); padded activations
            # have k == Kp.  Slab rows beyond the logical K are zero, so either
            # way the contraction is exact.
            k = a.shape[1]
            return jnp.dot(a, slab_ref[off:off + k, :Np],
                           preferred_element_type=jnp.float32)

        x = x_ref[...]                       # true (B, in_dim), no wrapper pad
        tmp_skip = None
        tmp_layers = []                      # traced activations (stay in vregs)

        for idx, layer in enumerate(layers):
            if tmp_skip is not None and layer[0] == "linear":
                w_off, Kp, b_off, Np = linear_meta[idx]
                x_tmp = dot(x, w_off, Kp, Np) + slab_ref[b_off:b_off + 1, :Np] + tmp_skip
                if idx in skip_connection:
                    infos, sNp = skip_meta[idx]
                    chunks = [x] + tmp_layers            # == torch.cat order
                    acc = dot(chunks[0], infos[0][0], infos[0][1], sNp)
                    for c in range(1, len(infos)):       # split dots replace concat
                        acc = acc + dot(chunks[c], infos[c][0], infos[c][1], sNp)
                    tmp_skip = acc
                    tmp_layers.insert(0, x)
                else:
                    tmp_skip = None
                    tmp_layers = []
                x = x_tmp
            else:
                if idx in skip_connection:
                    infos, sNp = skip_meta[idx]
                    tmp_skip = dot(x, infos[0][0], infos[0][1], sNp)
                    tmp_layers.append(x)
                if layer[0] == "linear":
                    w_off, Kp, b_off, Np = linear_meta[idx]
                    x = dot(x, w_off, Kp, Np) + slab_ref[b_off:b_off + 1, :Np]
                else:                                    # ReLU fused in-register
                    x = jnp.maximum(x, 0.0)

        # True-shape (masked) store: padded lanes/rows never reach HBM.
        o_ref[...] = x[:, :out_dim].astype(o_ref.dtype)

    vmem = pl.BlockSpec(memory_space=pltpu.MemorySpace.VMEM)
    # Footprint-derived limit (slab + activations + compiler scratch headroom),
    # capped well below v7x's 64 MiB physical VMEM.
    vmem_limit = min(32 * 1024 * 1024,
                     max(8 * 1024 * 1024, 2 * slab_bytes + 4 * 1024 * 1024))

    @jax.jit
    def _forward(x, slab_arg):
        B = x.shape[0]
        call = pl.pallas_call(
            kernel,
            out_shape=jax.ShapeDtypeStruct((B, out_dim), jnp.float32),
            in_specs=[vmem, vmem],
            out_specs=vmem,
            compiler_params=pltpu.CompilerParams(vmem_limit_bytes=vmem_limit),
        )
        return call(x.astype(jnp.float32), slab_arg)

    def forward(x):
        # slab passed as a runtime argument (not a jit closure constant).
        return _forward(x, slab)

    return forward


# Pure-JAX reference with identical semantics (mirrors torch forward()).
def reference_forward(x, layers, skip_connection):
    tmp_skip_output = None
    tmp_layers = []
    for idx, layer in enumerate(layers):
        if (tmp_skip_output is not None) and layer[0] == "linear":
            _, w, b = layer
            x_tmp = x @ w + b + tmp_skip_output
            if idx in skip_connection:
                cat_in = jnp.concatenate(
                    [x, jnp.concatenate(tmp_layers, axis=-1)], axis=-1)
                tmp_skip_output = cat_in @ skip_connection[idx]
                tmp_layers.insert(0, x)
            else:
                tmp_skip_output = None
                tmp_layers = []
            x = x_tmp
        else:
            if idx in skip_connection:
                tmp_skip_output = x @ skip_connection[idx]
                tmp_layers.append(x)
            if layer[0] == "linear":
                _, w, b = layer
                x = x @ w + b
            else:
                x = jnp.maximum(x, 0.0)
    return x


# --------------------------------- main ------------------------------------
if __name__ == "__main__":
    # Synthetic "post-compression" MLP:
    #   layers = [Linear(32->16), ReLU, Linear(16->24), ReLU, Linear(24->8)]
    #   skip_connection = {0: Linear(32->24, bias=False),
    #                      2: Linear(16+32 -> 8, bias=False)}   (chained skips)
    B, D_IN, H1, H2, D_OUT = 2, 32, 16, 24, 8

    key = jax.random.PRNGKey(0)
    ks = jax.random.split(key, 9)

    def mk_w(k, fan_in, fan_out):
        return (0.1 * jax.random.normal(k, (fan_in, fan_out))).astype(jnp.float32)

    def mk_b(k, fan_out):
        return (0.1 * jax.random.normal(k, (1, fan_out))).astype(jnp.float32)

    layers = [
        ("linear", mk_w(ks[0], D_IN, H1), mk_b(ks[1], H1)),
        ("relu",),
        ("linear", mk_w(ks[2], H1, H2), mk_b(ks[3], H2)),
        ("relu",),
        ("linear", mk_w(ks[4], H2, D_OUT), mk_b(ks[5], D_OUT)),
    ]
    skip_connection = {
        0: mk_w(ks[6], D_IN, H2),          # skip from input of L0 to output of L2
        2: mk_w(ks[7], H1 + D_IN, D_OUT),  # chained skip (cat of inputs) to output of L4
    }

    x = jax.random.normal(ks[8], (B, D_IN), dtype=jnp.float32)

    fused_forward = build_fused_forward(layers, skip_connection, D_IN)
    out = jax.block_until_ready(fused_forward(x))

    ref = reference_forward(x, layers, skip_connection)
    assert out.shape == (B, D_OUT), out.shape
    assert jnp.allclose(out, ref, atol=1e-5, rtol=1e-5), (out, ref)

    print("KERNEL_OK")
</pallas_src>

<mosaic_0001>
module attributes {stable_mosaic.version = 11 : i64} {
  func.func @kernel(%arg0: memref<2x32xf32, #tpu.memory_space<vmem>>, %arg1: memref<792x128xf32, #tpu.memory_space<vmem>>, %arg2: memref<2x8xf32, #tpu.memory_space<vmem>>) attributes {dimension_semantics = [], scalar_prefetch = 0 : i64, scratch_operands = 0 : i64, tpu.core_type = #tpu.core_type<tc>} {
    %c0 = arith.constant 0 : index
    %c0_0 = arith.constant 0 : index
    %0 = vector.load %arg0[%c0, %c0_0] : memref<2x32xf32, #tpu.memory_space<vmem>>, vector<2x32xf32>
    %c408 = arith.constant 408 : index
    %c0_1 = arith.constant 0 : index
    %1 = vector.load %arg1[%c408, %c0_1] : memref<792x128xf32, #tpu.memory_space<vmem>>, vector<32x128xf32>
    %cst = arith.constant dense<0.000000e+00> : vector<2x128xf32>
    %2 = tpu.matmul %0, %1, %cst {dimension_numbers = #tpu.dot_dimension_numbers<[1], [0], [0], [1], [0, 0, 1, 1], [], []>} : vector<2x32xf32>, vector<32x128xf32>, vector<2x128xf32> -> vector<2x128xf32>
    %c0_2 = arith.constant 0 : index
    %c0_3 = arith.constant 0 : index
    %3 = vector.load %arg1[%c0_2, %c0_3] : memref<792x128xf32, #tpu.memory_space<vmem>>, vector<32x128xf32>
    %cst_4 = arith.constant dense<0.000000e+00> : vector<2x128xf32>
    %4 = tpu.matmul %0, %3, %cst_4 {dimension_numbers = #tpu.dot_dimension_numbers<[1], [0], [0], [1], [0, 0, 1, 1], [], []>} : vector<2x32xf32>, vector<32x128xf32>, vector<2x128xf32> -> vector<2x128xf32>
    %c128 = arith.constant 128 : index
    %c0_5 = arith.constant 0 : index
    %5 = vector.load %arg1[%c128, %c0_5] : memref<792x128xf32, #tpu.memory_space<vmem>>, vector<1x128xf32>
    %6 = vector.broadcast %5 : vector<1x128xf32> to vector<2x128xf32>
    %7 = arith.addf %4, %6 : vector<2x128xf32>
    %cst_6 = arith.constant 0.000000e+00 : f32
    %8 = vector.broadcast %cst_6 : f32 to vector<2x128xf32>
    %9 = arith.maximumf %7, %8 : vector<2x128xf32>
    %c136 = arith.constant 136 : index
    %c0_7 = arith.constant 0 : index
    %10 = vector.load %arg1[%c136, %c0_7] : memref<792x128xf32, #tpu.memory_space<vmem>>, vector<128x128xf32>
    %cst_8 = arith.constant dense<0.000000e+00> : vector<2x128xf32>
    %11 = tpu.matmul %9, %10, %cst_8 {dimension_numbers = #tpu.dot_dimension_numbers<[1], [0], [0], [1], [0, 0, 1, 1], [], []>} : vector<2x128xf32>, vector<128x128xf32>, vector<2x128xf32> -> vector<2x128xf32>
    %c264 = arith.constant 264 : index
    %c0_9 = arith.constant 0 : index
    %12 = vector.load %arg1[%c264, %c0_9] : memref<792x128xf32, #tpu.memory_space<vmem>>, vector<1x128xf32>
    %13 = vector.broadcast %12 : vector<1x128xf32> to vector<2x128xf32>
    %14 = arith.addf %11, %13 : vector<2x128xf32>
    %15 = arith.addf %14, %2 : vector<2x128xf32>
    %c536 = arith.constant 536 : index
    %c0_10 = arith.constant 0 : index
    %16 = vector.load %arg1[%c536, %c0_10] : memref<792x128xf32, #tpu.memory_space<vmem>>, vector<128x128xf32>
    %cst_11 = arith.constant dense<0.000000e+00> : vector<2x128xf32>
    %17 = tpu.matmul %9, %16, %cst_11 {dimension_numbers = #tpu.dot_dimension_numbers<[1], [0], [0], [1], [0, 0, 1, 1], [], []>} : vector<2x128xf32>, vector<128x128xf32>, vector<2x128xf32> -> vector<2x128xf32>
    %c664 = arith.constant 664 : index
    %c0_12 = arith.constant 0 : index
    %18 = vector.load %arg1[%c664, %c0_12] : memref<792x128xf32, #tpu.memory_space<vmem>>, vector<32x128xf32>
    %cst_13 = arith.constant dense<0.000000e+00> : vector<2x128xf32>
    %19 = tpu.matmul %0, %18, %cst_13 {dimension_numbers = #tpu.dot_dimension_numbers<[1], [0], [0], [1], [0, 0, 1, 1], [], []>} : vector<2x32xf32>, vector<32x128xf32>, vector<2x128xf32> -> vector<2x128xf32>
    %20 = arith.addf %17, %19 : vector<2x128xf32>
    %cst_14 = arith.constant 0.000000e+00 : f32
    %21 = vector.broadcast %cst_14 : f32 to vector<2x128xf32>
    %22 = arith.maximumf %15, %21 : vector<2x128xf32>
    %c272 = arith.constant 272 : index
    %c0_15 = arith.constant 0 : index
    %23 = vector.load %arg1[%c272, %c0_15] : memref<792x128xf32, #tpu.memory_space<vmem>>, vector<128x128xf32>
    %cst_16 = arith.constant dense<0.000000e+00> : vector<2x128xf32>
    %24 = tpu.matmul %22, %23, %cst_16 {dimension_numbers = #tpu.dot_dimension_numbers<[1], [0], [0], [1], [0, 0, 1, 1], [], []>} : vector<2x128xf32>, vector<128x128xf32>, vector<2x128xf32> -> vector<2x128xf32>
    %c400 = arith.constant 400 : index
    %c0_17 = arith.constant 0 : index
    %25 = vector.load %arg1[%c400, %c0_17] : memref<792x128xf32, #tpu.memory_space<vmem>>, vector<1x128xf32>
    %26 = vector.broadcast %25 : vector<1x128xf32> to vector<2x128xf32>
    %27 = arith.addf %24, %26 : vector<2x128xf32>
    %28 = arith.addf %27, %20 : vector<2x128xf32>
    %29 = vector.extract_strided_slice %28 {offsets = [0, 0], sizes = [2, 8], strides = [1, 1]} : vector<2x128xf32> to vector<2x8xf32>
    %c0_18 = arith.constant 0 : index
    %c0_19 = arith.constant 0 : index
    %30 = vector.load %arg2[%c0_18, %c0_19] : memref<2x8xf32, #tpu.memory_space<vmem>>, vector<2x8xf32>
    tpu.vector_store %arg2[%c0_18, %c0_19], %29 {strides = array<i32>} : memref<2x8xf32, #tpu.memory_space<vmem>>, vector<2x8xf32>,
    return
  }
}

</mosaic_0001>

<bundles_post_ra>
// kernel: _forward.1
= control target key start
LH: loop header
LB: loop body
LE: loop exit
PB: predicated region body
PF: predicated region fallthrough
CT: control target
= control target key end

     0   :  { %7 = vsyncpa [#allocation3], 0  ;;  %s1063_s0 = inlined_call_operand.hbm [shape: f32[2,32], index: 0, kind: input, shape index: {}]   ;;  %s1064_s1 = inlined_call_operand.hbm [shape: f32[792,128], index: 1, kind: input, shape index: {}]   ;;  %s1065_s2 = inlined_call_operand.hbm [shape: f32[2,8], index: 2, kind: output, shape index: {}]  }
   0x1   :  { %8 = vsyncpa [#allocation6], 0 }
   0x2   :  { %9 = vsyncpa [#allocation4], 0  ;;  %s947_s9 = smov [#allocation2]   ;;  %s948_s11 = smov [#allocation5]  }
   0x3   :  { %s16_s10 = sshll.u32 %s947_s9, 4  ;;  %s25_s12 = sshll.u32 %s948_s11, 4  ;;  %s17_s10 = int_to_ptr.vmem [resolvable:$true] %s16_s10  ;;  %s970_s12 = int_to_ptr.vmem [resolvable:$true] %s25_s12 }
   0x4   :  { %s875_s15 = scalar_lea.hbm %s1063_s0, 32 }
   0x5   :  { %p876_p0 = scmp.ne.s32.totalorder %s1063_s0, %s875_s15  ;;  %p879_p1 = scmp.lt.u32.totalorder %s875_s15, %s1063_s0 }
   0x7   :  { %p881_p2 = pnand %p879_p1, %p876_p0 }
   0x9   :  { %884 = shalt.err (!%p881_p2)
}
   0xa   :  { %s885_s20 = scalar_lea.vmem %s17_s10, 32  ;;  %p890_p4 = scmp.lt.s32.totalorder %s17_s10, %s17_s10 }
   0xb   :  { %p886_p3 = scmp.ne.s32.totalorder %s17_s10, %s885_s20  ;;  %p891_p5 = scmp.lt.s32.totalorder %s885_s20, %s885_s20 }
   0xd   :  { %p892_p6 = por %p891_p5, %p890_p4 }
   0xf   :  { %p893_p7 = pnand %p892_p6, %p886_p3 }
  0x11   :  { %896 = shalt.err (!%p893_p7)
}
  0x12   :  { %19 = dma.hbm_to_vmem [thread:$0]  %s1063_s0, 32, %s17_s10, [#allocation3]  }
  0x13   :  { %s897_s25 = scalar_lea.hbm %s1064_s1, 12672 }
  0x14   :  { %p898_p8 = scmp.ne.s32.totalorder %s1064_s1, %s897_s25  ;;  %p901_p9 = scmp.lt.u32.totalorder %s897_s25, %s1064_s1 }
  0x16   :  { %p903_p10 = pnand %p901_p9, %p898_p8 }
  0x18   :  { %906 = shalt.err (!%p903_p10)
}
  0x19   :  { %s907_s30 = scalar_lea.vmem %s970_s12, 12672  ;;  %p912_p12 = scmp.lt.s32.totalorder %s970_s12, %s970_s12 }
  0x1a   :  { %p908_p11 = scmp.ne.s32.totalorder %s970_s12, %s907_s30  ;;  %p913_p13 = scmp.lt.s32.totalorder %s907_s30, %s907_s30 }
  0x1c   :  { %p914_p0 = por %p913_p13, %p912_p12 }
  0x1e   :  { %p915_p1 = pnand %p914_p0, %p908_p11 }
  0x20   :  { %918 = shalt.err (!%p915_p1)
}
  0x21   :  { %s949_s0 = smov 128   ;;  %s950_s3 = smov 8  }
  0x22   :  { %31 = dma.hbm_to_vmem [thread:$0]  %s1064_s1, 12672, %s970_s12, [#allocation6], %s949_s0, %s949_s0, %s950_s3  }
  0x23   :  { %941 = dma.done.wait [#allocation3], 32  }
  0x24   :  { %942 = vsyncadd [#allocation3], 4294967264 }
  0x25   :  { %943 = dma.done.wait [#allocation6], 12672  }
  0x26   :  { %944 = vsyncadd [#allocation6], 4294954624  ;;  %v951_v0 = vmov 0.0|0.0   ;;  %vm952_vm0 = vmmov 0   ;;  %v953_v1 = vmov 0.0   ;;  %v39_v2 = vld [vmem:[#allocation5 + $0x198] sm:$0xff] }
  0x27   :  { %770 = vmatprep.subr.bf16.mxu0 %v951_v0  ;;  %640 = vmatprep.mubr.msk.f32.mxu0 %vm952_vm0, %v953_v1  ;;  %v40_v3 = vld [vmem:[#allocation5 + $0x1a0] sm:$0xff]  ;;  %v41_v4 = vld [vmem:[#allocation5 + $0x1a8] sm:$0xff]  ;;  %v42_v6 = vld [vmem:[#allocation5 + $0x1b0] sm:$0xff]  ;;  %vm43_vm1 = vcmask 261120   ;;  %s954_s1 = smov [#allocation7]   ;;  %vm542_vm2 = vcmask 58368  }
  0x28   :  { %812 = vmatprep.subr.bf16.mxu1 %v951_v0  ;;  %732 = vmatprep.mubr.msk.f32.mxu1 %vm952_vm0, %v953_v1  ;;  %v771_v5 = vpack.c.bf16 %v40_v3, %v39_v2  ;;  %v774_v7 = vpack.c.bf16 %v42_v6, %v41_v4  ;;  %v289_v8 = vld [vmem:[#allocation5 + $0x218] sm:$0xff]  ;;  %v117_v9 = vld [vmem:[#allocation5] sm:$0xff]  ;;  %v118_v10 = vld [vmem:[#allocation5 + $0x8] sm:$0xff]  ;;  %s550_s6 = sshll.u32 %s954_s1, 4  ;;  %s551_s6 = int_to_ptr.vmem [resolvable:$true] %s550_s6 }
  0x29   :  { %v290_v11 = vld [vmem:[#allocation5 + $0x220] sm:$0xff]  ;;  %v291_v13 = vld [vmem:[#allocation5 + $0x228] sm:$0xff]  ;;  %v292_v14 = vld [vmem:[#allocation5 + $0x230] sm:$0xff]  ;;  %v777_v16 = vpack.c.bf16 %v118_v10, %v117_v9  ;;  %s919_s7 = scalar_lea.vmem %s551_s6, 32  ;;  %p924_p3 = scmp.lt.s32.totalorder %s551_s6, %s551_s6 }
  0x2a   :  { %772 = vmatpush3.bf16.msra.mxu0 %v771_v5  ;;  %v813_v12 = vpack.c.bf16 %v290_v11, %v289_v8  ;;  %v1008_v15 = vld [vmem:[#allocation2] sm:$0x3]  ;;  %v119_v17 = vld [vmem:[#allocation5 + $0x10] sm:$0xff]  ;;  %v816_v19 = vpack.c.bf16 %v292_v14, %v291_v13  ;;  %v294_v21 = vld [vmem:[#allocation5 + $0x240] sm:$0xff]  ;;  %p920_p2 = scmp.ne.s32.totalorder %s551_s6, %s919_s7  ;;  %p925_p4 = scmp.lt.s32.totalorder %s919_s7, %s919_s7 }
  0x2b   :  { %773 = vmatprep.subr.bf16.mxu0 %v951_v0  ;;  %v120_v18 = vld [vmem:[#allocation5 + $0x18] sm:$0xff]  ;;  %v197_v23 = vld [vmem:[#allocation5 + $0x88] sm:$0xff]  ;;  %v198_v24 = vld [vmem:[#allocation5 + $0x90] sm:$0xff] }
  0x2c   :  { %814 = vmatpush3.bf16.msra.mxu1 %v813_v12  ;;  %v293_v20 = vld [vmem:[#allocation5 + $0x238] sm:$0xff]  ;;  %v780_v22 = vpack.c.bf16 %v120_v18, %v119_v17  ;;  %v295_v26 = vld [vmem:[#allocation5 + $0x248] sm:$0xff]  ;;  %v296_v27 = vld [vmem:[#allocation5 + $0x250] sm:$0xff]  ;;  %v783_v28 = vpack.c.bf16 %v198_v24, %v197_v23  ;;  %p926_p5 = por %p925_p4, %p924_p3 }
  0x2d   :  { %815 = vmatprep.subr.bf16.mxu1 %v951_v0  ;;  %v819_v25 = vpack.c.bf16 %v294_v21, %v293_v20  ;;  %v199_v29 = vld [vmem:[#allocation5 + $0x98] sm:$0xff]  ;;  %v200_v30 = vld [vmem:[#allocation5 + $0xa0] sm:$0xff]  ;;  %v822_v31 = vpack.c.bf16 %v296_v27, %v295_v26  ;;  %v201_v35 = vld [vmem:[#allocation5 + $0xa8] sm:$0xff] }
  0x2e   :  { %775 = vmatpush3.bf16.msra.mxu0 %v774_v7  ;;  %v297_v32 = vld [vmem:[#allocation5 + $0x258] sm:$0xff]  ;;  %v298_v33 = vld [vmem:[#allocation5 + $0x260] sm:$0xff]  ;;  %v786_v34 = vpack.c.bf16 %v200_v30, %v199_v29  ;;  %v202_v36 = vld [vmem:[#allocation5 + $0xb0] sm:$0xff]  ;;  %p927_p6 = pnand %p926_p5, %p920_p2 }
  0x2f   :  { %776 = vmatprep.subr.bf16.mxu0 %v951_v0  ;;  %v825_v37 = vpack.c.bf16 %v298_v33, %v297_v32  ;;  %v299_v38 = vld [vmem:[#allocation5 + $0x268] sm:$0xff]  ;;  %v300_v39 = vld [vmem:[#allocation5 + $0x270] sm:$0xff]  ;;  %v789_v40 = vpack.c.bf16 %v202_v36, %v201_v35  ;;  %v203_v41 = vld [vmem:[#allocation5 + $0xb8] sm:$0xff] }
  0x30   :  { %817 = vmatpush3.bf16.msra.mxu1 %v816_v19  ;;  %v204_v42 = vld [vmem:[#allocation5 + $0xc0] sm:$0xff]  ;;  %v828_v43 = vpack.c.bf16 %v300_v39, %v299_v38  ;;  %v301_v44 = vld [vmem:[#allocation5 + $0x278] sm:$0xff]  ;;  %v205_v47 = vld [vmem:[#allocation5 + $0xc8] sm:$0xff] }
  0x31   :  { %641 = vmatmul.mubr.msk.f32.vlgmr.msra.gmra.mrb[0].mxu0 %vm43_vm1, %v1008_v15  ;;  %818 = vmatprep.subr.bf16.mxu1 %v951_v0  ;;  %v302_v45 = vld [vmem:[#allocation5 + $0x280] sm:$0xff]  ;;  %v792_v46 = vpack.c.bf16 %v204_v42, %v203_v41  ;;  %v206_v48 = vld [vmem:[#allocation5 + $0xd0] sm:$0xff]  ;;  %v207_v51 = vld [vmem:[#allocation5 + $0xd8] sm:$0xff] }
  0x32   :  { %778 = vmatpush3.bf16.msra.mxu0 %v777_v16  ;;  %651 = vmatprep.mubr.msk.f32.mxu0 %vm952_vm0, %v953_v1  ;;  %v831_v49 = vpack.c.bf16 %v302_v45, %v301_v44  ;;  %v795_v50 = vpack.c.bf16 %v206_v48, %v205_v47  ;;  %v208_v52 = vld [vmem:[#allocation5 + $0xe0] sm:$0xff]  ;;  %v209_v54 = vld [vmem:[#allocation5 + $0xe8] sm:$0xff]  ;;  %v210_v55 = vld [vmem:[#allocation5 + $0xf0] sm:$0xff] }
  0x33   :  { %779 = vmatprep.subr.bf16.mxu0 %v951_v0  ;;  %v798_v53 = vpack.c.bf16 %v208_v52, %v207_v51  ;;  %v801_v56 = vpack.c.bf16 %v210_v55, %v209_v54  ;;  %v211_v57 = vld [vmem:[#allocation5 + $0xf8] sm:$0xff]  ;;  %v212_v58 = vld [vmem:[#allocation5 + $0x100] sm:$0xff]  ;;  %v303_v59 = vld [vmem:[#allocation5 + $0x288] sm:$0xff] }
  0x34   :  { %820 = vmatpush3.bf16.msra.mxu1 %v819_v25  ;;  %v804_v60 = vpack.c.bf16 %v212_v58, %v211_v57  ;;  %v304_v61 = vld [vmem:[#allocation5 + $0x290] sm:$0xff]  ;;  %v561_v63 = vld [vmem:[#allocation5 + $0x80] ss:$0 sm:$0xff]  ;;  %v451_v3 = vld [vmem:[#allocation5 + $0x118] sm:$0xff] }
  0x35   :  { %821 = vmatprep.subr.bf16.mxu1 %v951_v0  ;;  %v834_v62 = vpack.c.bf16 %v304_v61, %v303_v59  ;;  %v450_v2 = vld [vmem:[#allocation5 + $0x110] sm:$0xff]  ;;  %v305_v4 = vld [vmem:[#allocation5 + $0x298] sm:$0xff]  ;;  %v306_v5 = vld [vmem:[#allocation5 + $0x2a0] sm:$0xff] }
  0x36   :  { %781 = vmatpush3.bf16.msra.mxu0 %v780_v22  ;;  %v837_v9 = vpack.c.bf16 %v451_v3, %v450_v2  ;;  %v452_v10 = vld [vmem:[#allocation5 + $0x120] sm:$0xff]  ;;  %v807_v11 = vpack.c.bf16 %v306_v5, %v305_v4  ;;  %v453_v13 = vld [vmem:[#allocation5 + $0x128] sm:$0xff]  ;;  %v308_v16 = vld [vmem:[#allocation5 + $0x2b0] sm:$0xff] }
  0x37   :  { %782 = vmatprep.subr.bf16.mxu0 %v951_v0  ;;  %v307_v14 = vld [vmem:[#allocation5 + $0x2a8] sm:$0xff]  ;;  %v840_v17 = vpack.c.bf16 %v453_v13, %v452_v10  ;;  %v454_v19 = vld [vmem:[#allocation5 + $0x130] sm:$0xff]  ;;  %v455_v20 = vld [vmem:[#allocation5 + $0x138] sm:$0xff] }
  0x38   :  { %823 = vmatpush3.bf16.msra.mxu1 %v822_v31  ;;  %v810_v18 = vpack.c.bf16 %v308_v16, %v307_v14  ;;  %v843_v21 = vpack.c.bf16 %v455_v20, %v454_v19  ;;  %v456_v22 = vld [vmem:[#allocation5 + $0x140] sm:$0xff]  ;;  %v457_v23 = vld [vmem:[#allocation5 + $0x148] sm:$0xff]  ;;  %v458_v25 = vld [vmem:[#allocation5 + $0x150] sm:$0xff] }
  0x39   :  { %652 = vmatmul.mubr.msk.f32.vlgmr.msra.gmra.mrb[2].mxu0 %vm43_vm1, %v1008_v15  ;;  %824 = vmatprep.subr.bf16.mxu1 %v951_v0  ;;  %v846_v24 = vpack.c.bf16 %v457_v23, %v456_v22  ;;  %v459_v26 = vld [vmem:[#allocation5 + $0x158] sm:$0xff]  ;;  %v462_v30 = vld [vmem:[#allocation5 + $0x170] sm:$0xff]  ;;  %v464_v32 = vld [vmem:[#allocation5 + $0x180] sm:$0xff] }
  0x3a   :  { %784 = vmatpush3.bf16.msra.mxu0 %v783_v28  ;;  %686 = vmatprep.mubr.msk.f32.mxu0 %vm952_vm0, %v953_v1  ;;  %v849_v27 = vpack.c.bf16 %v459_v26, %v458_v25  ;;  %v461_v28 = vld [vmem:[#allocation5 + $0x168] sm:$0xff]  ;;  %v463_v31 = vld [vmem:[#allocation5 + $0x178] sm:$0xff]  ;;  %v565_v42 = vld [vmem:[#allocation5 + $0x190] ss:$0 sm:$0xff] }
  0x3b   :  { %785 = vmatprep.subr.bf16.mxu0 %v951_v0  ;;  %v465_v33 = vld [vmem:[#allocation5 + $0x188] sm:$0xff] }
  0x3c   :  { %826 = vmatpush3.bf16.msra.mxu1 %v825_v37  ;;  %v563_v35 = vld [vmem:[#allocation5 + $0x108] ss:$0 sm:$0xff] }
  0x3d   :  { %827 = vmatprep.subr.bf16.mxu1 %v951_v0 }
  0x3e   :  { %787 = vmatpush3.bf16.msra.mxu0 %v786_v34  ;;  %v858_v34 = vpack.c.bf16 %v465_v33, %v464_v32 }
  0x3f   :  { %788 = vmatprep.subr.bf16.mxu0 %v951_v0 }
  0x40   :  { %829 = vmatpush3.bf16.msra.mxu1 %v828_v43 }
  0x41   :  { %830 = vmatprep.subr.bf16.mxu1 %v951_v0 }
  0x42   :  { %790 = vmatpush3.bf16.msra.mxu0 %v789_v40 }
  0x43   :  { %791 = vmatprep.subr.bf16.mxu0 %v951_v0 }
  0x44   :  { %832 = vmatpush3.bf16.msra.mxu1 %v831_v49 }
  0x45   :  { %833 = vmatprep.subr.bf16.mxu1 %v951_v0 }
  0x46   :  { %793 = vmatpush3.bf16.msra.mxu0 %v792_v46 }
  0x47   :  { %794 = vmatprep.subr.bf16.mxu0 %v951_v0 }
  0x48   :  { %835 = vmatpush3.bf16.msra.mxu1 %v834_v62 }
  0x49   :  { %836 = vmatprep.subr.bf16.mxu1 %v951_v0 }
  0x4a   :  { %796 = vmatpush3.bf16.msra.mxu0 %v795_v50 }
  0x4b   :  { %797 = vmatprep.subr.bf16.mxu0 %v951_v0 }
  0x4e   :  { %799 = vmatpush3.bf16.msra.mxu0 %v798_v53 }
  0x4f   :  { %800 = vmatprep.subr.bf16.mxu0 %v951_v0 }
  0x52   :  { %802 = vmatpush3.bf16.msra.mxu0 %v801_v56 }
  0x53   :  { %803 = vmatprep.subr.bf16.mxu0 %v951_v0 }
  0x56   :  { %805 = vmatpush3.bf16.msra.mxu0 %v804_v60 }
  0x57   :  { %806 = vmatprep.subr.bf16.mxu0 %v951_v0 }
 0x10c   :  { %v192_v6 = vpop.f32.mrb[2].mxu0 }
 0x10d   :  { %v193_v7 = vadd.f32 %v561_v63, %v192_v6  ;;  %v653_v8 = vpop.f32.mrb[3].mxu0 }
 0x10f   :  { %v196_v12 = vmax.f32 %v193_v7, 0.0 }
 0x111   :  { %687 = vmatmul.mubr.f32.vlgmr.msra.gmra.mrb[0].mxu0 %v196_v12  ;;  %733 = vmatmul.mubr.f32.vlgmr.msra.gmra.mrb[0].mxu1 %v196_v12 }
 0x112   :  { %838 = vmatpush3.bf16.msra.mxu1 %v837_v9  ;;  %808 = vmatpush3.bf16.msra.mxu0 %v807_v11 }
 0x113   :  { %839 = vmatprep.subr.bf16.mxu1 %v951_v0  ;;  %809 = vmatprep.subr.bf16.mxu0 %v951_v0 }
 0x114   :  { %697 = vmatprep.mubr.msk.f32.mxu0 %vm952_vm0, %v953_v1  ;;  %767 = vmatprep.mubr.msk.f32.mxu1 %vm952_vm0, %v953_v1  ;;  %v460_v1 = vld [vmem:[#allocation5 + $0x160] sm:$0xff] }
 0x115   :  { %v852_v29 = vpack.c.bf16 %v461_v28, %v460_v1 }
 0x116   :  { %841 = vmatpush3.bf16.msra.mxu1 %v840_v17  ;;  %811 = vmatpush3.bf16.msra.mxu0 %v810_v18 }
 0x117   :  { %842 = vmatprep.subr.bf16.mxu1 %v951_v0 }
 0x119   :  { %698 = vmatmul.mubr.msk.f32.vlgmr.msra.gmra.mrb[4].mxu0 %vm43_vm1, %v1008_v15  ;;  %v855_v15 = vpack.c.bf16 %v463_v31, %v462_v30 }
 0x11a   :  { %844 = vmatpush3.bf16.msra.mxu1 %v843_v21 }
 0x11b   :  { %845 = vmatprep.subr.bf16.mxu1 %v951_v0 }
 0x11e   :  { %847 = vmatpush3.bf16.msra.mxu1 %v846_v24 }
 0x11f   :  { %848 = vmatprep.subr.bf16.mxu1 %v951_v0 }
 0x122   :  { %850 = vmatpush3.bf16.msra.mxu1 %v849_v27 }
 0x123   :  { %851 = vmatprep.subr.bf16.mxu1 %v951_v0 }
 0x126   :  { %853 = vmatpush3.bf16.msra.mxu1 %v852_v29 }
 0x127   :  { %854 = vmatprep.subr.bf16.mxu1 %v951_v0 }
 0x12a   :  { %856 = vmatpush3.bf16.msra.mxu1 %v855_v15 }
 0x12b   :  { %857 = vmatprep.subr.bf16.mxu1 %v951_v0 }
 0x12e   :  { %859 = vmatpush3.bf16.msra.mxu1 %v858_v34 }
 0x1e4   :  { %v284_v36 = vpop.f32.mrb[0].mxu0 }
 0x1e5   :  { %v285_v37 = vadd.f32 %v563_v35, %v284_v36  ;;  %v688_v38 = vpop.f32.mrb[1].mxu0 }
 0x1e7   :  { %v449_v39 = vmax.f32 %v285_v37, 0.0 }
 0x1e9   :  { %768 = vmatmul.mubr.f32.vlgmr.msra.gmra.mrb[0].mxu1 %v449_v39 }
 0x1ec   :  { %v375_v40 = vpop.f32.mrb[4].mxu0 }
 0x1ed   :  { %v699_v41 = vpop.f32.mrb[5].mxu0  ;;  %v861_v43 = vadd.f32 %v565_v42, %v375_v40 }
 0x2bc   :  { %v537_v44 = vpop.f32.mrb[0].mxu1 }
 0x2bd   :  { %v862_v45 = vadd.f32 %v861_v43, %v537_v44  ;;  %v769_v0 = vpop.f32.mrb[1].mxu1 }
 0x2bf   :  { %543 = vst.msk [vmem:[#allocation7] sm:$0x3] %vm542_vm2, %v862_v45 }
 0x2c0   :  { %930 = shalt.err (!%p927_p6)
}
 0x2c1   :  { %s931_s10 = scalar_lea.hbm %s1065_s2, 32 }
 0x2c2   :  { %p932_p7 = scmp.ne.s32.totalorder %s1065_s2, %s931_s10  ;;  %p935_p8 = scmp.lt.u32.totalorder %s931_s10, %s1065_s2 }
 0x2c4   :  { %p937_p9 = pnand %p935_p8, %p932_p7 }
 0x2c6   :  { %940 = shalt.err (!%p937_p9)
}
 0x2c7   :  { %553 = dma.vmem_to_hbm [thread:$0]  %s551_s6, 32, %s1065_s2, [#allocation4]  }
 0x2c8   :  { %945 = dma.done.wait [#allocation4], 32  }
 0x2c9   :  { %946 = vsyncadd [#allocation4], 4294967264 }
 0x2ca   :  { %557 = vsyncpa [#allocation3], 1 }
 0x2cb   :  { %558 = vsyncpa [#allocation6], 1 }
 0x2cc   :  { %559 = vsyncpa [#allocation4], 1 }

</bundles_post_ra>
